<compile_context>
chip_gen: v6e
topology: v6e:2x2x1
jax: 0.10.0
libtpu: 0.0.40
codegen_flags: <defaults>
</compile_context>

<pallas_src>
import jax
import jax.numpy as jnp
from jax import lax
from jax.experimental import pallas as pl
from jax.experimental.pallas import tpu as pltpu

MEM_CH = 64  # WorkingMemory.mem_ch


def _round_up(a, b):
    return ((a + b - 1) // b) * b


def _sublane_pad(c, itemsize):
    # Sublane padding depends on dtype packing: f32 -> 8, bf16 -> 16, i8 -> 32.
    return _round_up(max(c, 1), max(8, 32 // max(itemsize, 1)))


def _vmem_capacity_bytes():
    try:
        return int(pltpu.get_tpu_info().vmem_capacity_bytes)
    except Exception:
        return 64 * 1024 * 1024  # v7x-safe fallback


def _choose_hw_tile(hw, c, itemsize, per_buffer_budget):
    """Largest H*W tile whose double-buffered x block fits the budget."""
    if hw <= 256:
        return hw                          # single full-dim block
    c_pad = _sublane_pad(c, itemsize)
    max_lanes = per_buffer_budget // (c_pad * itemsize)
    max_lanes = max(512, (max_lanes // 512) * 512)
    hw_floor = (hw // 128) * 128           # keep blocks inside the array
    return min(hw_floor, max_lanes)


def _make_wm_query_kernel(hw, hw_tile, c, x_dtype):
    num_tiles = -(-hw // hw_tile)                   # cdiv
    rem = hw - (num_tiles - 1) * hw_tile            # valid lanes in last block
    needs_mask = rem != hw_tile
    last = num_tiles - 1

    if hw_tile % 128 == 0:
        lanes = max(l for l in (1024, 512, 256, 128) if hw_tile % l == 0)
    else:
        lanes = hw_tile                             # single full-dim block
    n_micro_full = hw_tile // lanes                 # micro-chunks per full block
    n_micro_last = rem // lanes                     # full micro-chunks, last block
    tail_w = rem - n_micro_last * lanes             # ragged tail width (maybe 0)

    use_mxu_sum = jnp.dtype(x_dtype) == jnp.dtype(jnp.bfloat16)
    inv_hw = 1.0 / float(hw)

    def kernel(x_ref, mem_ref, w1a_ref, w1m_ref, w1mem_ref, b1_ref, w2_ref,
               b2_ref, o_ref, sum_acc, max_acc):
        k = pl.program_id(1)

        @pl.when(k == 0)
        def _init():
            sum_acc[...] = jnp.zeros_like(sum_acc)
            max_acc[...] = jnp.full_like(max_acc, -jnp.inf)

        # Hoisted outside the micro loops (JAX does not CSE broadcasts).
        if use_mxu_sum:
            ones = jnp.ones((lanes, 128), dtype=x_dtype)

        def accumulate(x_for_sum, x_for_max):
            if use_mxu_sum:
                # bf16 ones-dot: sum goes to the idle MXU, f32 accumulate.
                sum_acc[...] += jnp.dot(x_for_sum, ones,
                                        preferred_element_type=jnp.float32)
            else:
                sum_acc[...] += x_for_sum.astype(jnp.float32)
            # Max stays in the input's native dtype (exact); widened once at
            # finalize.
            max_acc[...] = jnp.maximum(max_acc[...], x_for_max)

        def micro(base):
            xj = x_ref[0, :, pl.ds(base, lanes)]          # (C, lanes) native
            accumulate(xj, xj)

        def micro_masked(base, width):
            xj = x_ref[0, :, pl.ds(base, lanes)]
            lane_idx = lax.broadcasted_iota(jnp.int32, (c, lanes), 1)
            valid = lane_idx < width
            accumulate(jnp.where(valid, xj, jnp.zeros_like(xj)),
                       jnp.where(valid, xj, jnp.full_like(xj, -jnp.inf)))

        def run_micro_loop(n):
            if n <= 0:
                return
            if n <= 8:                                     # unrolled (scheduler)
                for j in range(n):
                    micro(j * lanes)
            else:
                def body(j, carry):
                    micro(pl.multiple_of(j * lanes, lanes))
                    return carry
                lax.fori_loop(0, n, body, 0)

        if not needs_mask:
            run_micro_loop(n_micro_full)
        else:
            # Mask-free hot loop; the tail mask only runs on the final block.
            @pl.when(k != last)
            def _hot():
                run_micro_loop(n_micro_full)

            @pl.when(k == last)
            def _masked_tail():
                run_micro_loop(n_micro_last)
                if tail_w > 0:
                    micro_masked(n_micro_last * lanes, tail_w)

        @pl.when(k == last)
        def _finalize():
            if use_mxu_sum:
                s = sum_acc[:, 0:1]                        # lanes identical
            else:
                s = jnp.sum(sum_acc[...], axis=-1, keepdims=True)
            avg_col = s * inv_hw                                     # (C, 1)
            mx_col = jnp.max(max_acc[...].astype(jnp.float32), axis=-1,
                             keepdims=True)                          # (C, 1)
            mem_col = mem_ref[0].astype(jnp.float32)                 # (64, 1)

            w1a = w1a_ref[...].astype(jnp.float32)                   # (C, mid)
            w1m = w1m_ref[...].astype(jnp.float32)                   # (C, mid)
            w1mem = w1mem_ref[...].astype(jnp.float32)               # (64, mid)
            mid = w2_ref.shape[0]

            # Concat-free first layer == avg@w1[:C] + max@w1[C:2C] + mem@w1[2C:]
            # done as broadcast-multiply + sublane reduce (full f32).
            h = (jnp.sum(avg_col * w1a, axis=0, keepdims=True)
                 + jnp.sum(mx_col * w1m, axis=0, keepdims=True)
                 + jnp.sum(mem_col * w1mem, axis=0, keepdims=True)
                 + b1_ref[...].astype(jnp.float32))                  # (1, mid)
            h = jnp.maximum(h, 0.0)
            h_col = h.reshape(mid, 1)
            out = (jnp.sum(h_col * w2_ref[...].astype(jnp.float32),
                           axis=0, keepdims=True)
                   + b2_ref[...].astype(jnp.float32))                # (1, out)
            o_ref[0] = out.astype(o_ref.dtype)

    scratch = [
        pltpu.VMEM((c, 128 if use_mxu_sum else lanes), jnp.float32),  # sum
        pltpu.VMEM((c, lanes), x_dtype),                              # max
    ]
    return kernel, scratch, num_tiles


def working_memory_query(x, mem, w1, b1, w2, b2, *, reshape_like_input=False,
                         hw_tile=None):
    """Pallas implementation of WorkingMemoryQuery.forward (memory enabled)."""
    B, C, H, W = x.shape
    HW = H * W
    in_total = 2 * C + MEM_CH
    assert w1.shape[0] == in_total, "w1 must be (2*C + 64, mid)"
    mid_ch = w1.shape[1]
    out_ch = w2.shape[1]

    # Metadata-only reshapes; x stays in its native dtype (no f32 HBM copy).
    x3 = x.reshape(B, C, HW)
    mem3 = mem.reshape(B, MEM_CH, 1)   # column layout -> no in-kernel relayout

    # Pre-split w1 so the kernel never concatenates along the lane axis.
    w1a, w1m, w1mem = w1[:C], w1[C:2 * C], w1[2 * C:]

    itemsize = jnp.dtype(x.dtype).itemsize
    cap = _vmem_capacity_bytes()
    if hw_tile is None:
        hw_tile = _choose_hw_tile(HW, C, itemsize, per_buffer_budget=cap // 5)
    assert hw_tile == HW or (hw_tile % 128 == 0 and hw_tile <= HW), \
        "hw_tile must equal H*W or be a multiple of 128 not exceeding H*W"

    kernel, scratch, num_tiles = _make_wm_query_kernel(HW, hw_tile, C, x.dtype)

    c_pad = _sublane_pad(C, itemsize)
    block_bytes = c_pad * _round_up(hw_tile, 128) * itemsize
    vmem_needed = 2 * block_bytes + 4 * 1024 * 1024
    vmem_limit = int(min(int(cap * 0.9), max(vmem_needed, 32 * 1024 * 1024)))

    flops = int(2 * B * C * HW
                + 2 * B * (in_total * mid_ch + mid_ch * out_ch))
    bytes_accessed = int(
        x3.size * itemsize
        + mem3.size * jnp.dtype(mem.dtype).itemsize
        + (w1.size + b1.size + w2.size + b2.size) * jnp.dtype(w1.dtype).itemsize
        + B * out_ch * itemsize)

    # TODO(synk): for B == 1 on v7x (2 TensorCores) the parallel batch axis
    # cannot use both cores; splitting the H*W reduction into per-core partials
    # plus a tiny combine step would recover ~2x there.
    out = pl.pallas_call(
        kernel,
        out_shape=jax.ShapeDtypeStruct((B, 1, out_ch), x.dtype),
        grid_spec=pltpu.PrefetchScalarGridSpec(
            num_scalar_prefetch=0,
            grid=(B, num_tiles),
            in_specs=[
                pl.BlockSpec((1, C, hw_tile), lambda b, k: (b, 0, k)),
                pl.BlockSpec((1, MEM_CH, 1), lambda b, k: (b, 0, 0)),
                pl.BlockSpec(w1a.shape, lambda b, k: (0, 0)),
                pl.BlockSpec(w1m.shape, lambda b, k: (0, 0)),
                pl.BlockSpec(w1mem.shape, lambda b, k: (0, 0)),
                pl.BlockSpec(b1.shape, lambda b, k: (0, 0)),
                pl.BlockSpec(w2.shape, lambda b, k: (0, 0)),
                pl.BlockSpec(b2.shape, lambda b, k: (0, 0)),
            ],
            out_specs=pl.BlockSpec((1, 1, out_ch), lambda b, k: (b, 0, 0)),
            scratch_shapes=scratch,
        ),
        compiler_params=pltpu.CompilerParams(
            dimension_semantics=("parallel", "arbitrary"),
            vmem_limit_bytes=vmem_limit,
        ),
        cost_estimate=pl.CostEstimate(flops=flops, transcendentals=0,
                                      bytes_accessed=bytes_accessed),
    )(x3, mem3, w1a, w1m, w1mem, b1, w2, b2)

    out = out.reshape(B, out_ch, 1, 1)
    if reshape_like_input:
        # x.repeat((1, 1, h, w)) on a (B, out_ch, 1, 1) tensor == broadcast.
        out = jnp.broadcast_to(out, (B, out_ch, H, W))
    return out


def _reference(x, mem, w1, b1, w2, b2, reshape_like_input=False):
    B, C, H, W = x.shape
    xf = x.astype(jnp.float32)
    avg = jnp.mean(xf, axis=(2, 3))
    mx = jnp.max(xf.reshape(B, C, -1), axis=-1)
    feat = jnp.concatenate(
        [avg, mx, mem.reshape(B, MEM_CH).astype(jnp.float32)], axis=1)
    h = jnp.maximum(
        jnp.dot(feat, w1, precision=lax.Precision.HIGHEST) + b1, 0.0)
    out = (jnp.dot(h, w2, precision=lax.Precision.HIGHEST)
           + b2).reshape(B, -1, 1, 1)
    if reshape_like_input:
        out = jnp.broadcast_to(out, (B, out.shape[1], H, W))
    return out


if __name__ == "__main__":
    # Small shapes consistent with the module.
    B, C, H, W = 2, 4, 16, 16
    out_ch = 8
    in_total = 2 * C + MEM_CH        # cat([avg, max, mem]) channels = 72
    mid_ch = 2 * out_ch              # MLP hidden = out_ch * 2

    key = jax.random.PRNGKey(0)
    kx, kw1, kb1, kw2, kb2, kmem = jax.random.split(key, 6)

    x = jax.random.normal(kx, (B, C, H, W), dtype=jnp.float32)
    # WorkingMemory state (B, mem_ch, 1, 1) squeezed to (B, mem_ch); non-zero
    # so the mem @ w1[2C:] path is exercised.
    mem = 0.5 * jax.random.normal(kmem, (B, MEM_CH), dtype=jnp.float32)

    # "conv1x1" parameters stored as (in, out) matmul matrices.
    w1 = 0.1 * jax.random.normal(kw1, (in_total, mid_ch), dtype=jnp.float32)
    b1 = 0.1 * jax.random.normal(kb1, (1, mid_ch), dtype=jnp.float32)
    w2 = 0.1 * jax.random.normal(kw2, (mid_ch, out_ch), dtype=jnp.float32)
    b2 = 0.1 * jax.random.normal(kb2, (1, out_ch), dtype=jnp.float32)

    # TODO(synk): the WorkingMemory-disabled path (return zeros, no compute) is
    # Python-side control flow in torch and is handled outside the kernel.

    y_ref = _reference(x, mem, w1, b1, w2, b2)

    # 1) Default tile (single reduction step at this spatial size).
    y = working_memory_query(x, mem, w1, b1, w2, b2)
    jax.block_until_ready(y)
    assert y.shape == (B, out_ch, 1, 1)
    assert jnp.allclose(y, y_ref, atol=1e-4, rtol=1e-4), "mismatch (default)"

    # 2) Forced multi-step tiled reduction (accumulator / hot-loop path).
    y2 = working_memory_query(x, mem, w1, b1, w2, b2, hw_tile=128)
    jax.block_until_ready(y2)
    assert jnp.allclose(y2, y_ref, atol=1e-4, rtol=1e-4), "mismatch (tiled)"

    # 3) reshape_like_input=True (broadcast to (B, out_ch, H, W)).
    y3 = working_memory_query(x, mem, w1, b1, w2, b2, reshape_like_input=True)
    jax.block_until_ready(y3)
    assert y3.shape == (B, out_ch, H, W)
    assert jnp.allclose(
        y3, _reference(x, mem, w1, b1, w2, b2, reshape_like_input=True),
        atol=1e-4, rtol=1e-4), "mismatch (reshape_like_input)"

    # 4) bf16 activations: MXU ones-dot sum path + native-bf16 max accumulator.
    xb = x.astype(jnp.bfloat16)
    memb = mem.astype(jnp.bfloat16)
    yb = working_memory_query(xb, memb, w1, b1, w2, b2, hw_tile=128)
    jax.block_until_ready(yb)
    assert yb.dtype == jnp.bfloat16
    yb_ref = _reference(xb, memb, w1, b1, w2, b2)
    assert jnp.allclose(yb.astype(jnp.float32), yb_ref, atol=2e-2, rtol=2e-2), \
        "mismatch (bf16 / MXU-sum path)"

    # 5) Non-multiple-of-128 spatial size: tail mask runs only on the last step.
    x_odd = jax.random.normal(kx, (B, C, 15, 15), dtype=jnp.float32)
    y_odd = working_memory_query(x_odd, mem, w1, b1, w2, b2, hw_tile=128)
    jax.block_until_ready(y_odd)
    assert jnp.allclose(y_odd, _reference(x_odd, mem, w1, b1, w2, b2),
                        atol=1e-4, rtol=1e-4), "mismatch (tail mask)"

    # 6) Odd spatial size with the default (single full-dim block) tile.
    y_odd2 = working_memory_query(x_odd, mem, w1, b1, w2, b2)
    jax.block_until_ready(y_odd2)
    assert jnp.allclose(y_odd2, _reference(x_odd, mem, w1, b1, w2, b2),
                        atol=1e-4, rtol=1e-4), "mismatch (full-dim block)"

    print("KERNEL_OK")
</pallas_src>

<mosaic_0001>
module attributes {stable_mosaic.version = 11 : i64} {
  func.func @kernel(%arg0: i32, %arg1: i32, %arg2: memref<1x4x256xf32, #tpu.memory_space<vmem>>, %arg3: memref<1x64x1xf32, #tpu.memory_space<vmem>>, %arg4: memref<4x16xf32, #tpu.memory_space<vmem>>, %arg5: memref<4x16xf32, #tpu.memory_space<vmem>>, %arg6: memref<64x16xf32, #tpu.memory_space<vmem>>, %arg7: memref<1x16xf32, #tpu.memory_space<vmem>>, %arg8: memref<16x8xf32, #tpu.memory_space<vmem>>, %arg9: memref<1x8xf32, #tpu.memory_space<vmem>>, %arg10: memref<1x1x8xf32, #tpu.memory_space<vmem>>, %arg11: memref<4x256xf32, #tpu.memory_space<vmem>>, %arg12: memref<4x256xf32, #tpu.memory_space<vmem>>) attributes {dimension_semantics = [#tpu.dimension_semantics<parallel>, #tpu.dimension_semantics<arbitrary>], iteration_bounds = array<i64: 2, 1>, scalar_prefetch = 0 : i64, scratch_operands = 2 : i64, tpu.core_type = #tpu.core_type<tc>, window_params = [{transform_indices = @transform_0, window_bounds = array<i64: 1, 4, 256>}, {transform_indices = @transform_1, window_bounds = array<i64: 1, 64, 1>}, {pipeline_mode = #tpu.pipeline_mode<synchronous>, transform_indices = @transform_2, window_bounds = array<i64: 4, 16>}, {pipeline_mode = #tpu.pipeline_mode<synchronous>, transform_indices = @transform_3, window_bounds = array<i64: 4, 16>}, {pipeline_mode = #tpu.pipeline_mode<synchronous>, transform_indices = @transform_4, window_bounds = array<i64: 64, 16>}, {pipeline_mode = #tpu.pipeline_mode<synchronous>, transform_indices = @transform_5, window_bounds = array<i64: 1, 16>}, {pipeline_mode = #tpu.pipeline_mode<synchronous>, transform_indices = @transform_6, window_bounds = array<i64: 16, 8>}, {pipeline_mode = #tpu.pipeline_mode<synchronous>, transform_indices = @transform_7, window_bounds = array<i64: 1, 8>}, {transform_indices = @transform_8, window_bounds = array<i64: 1, 1, 8>}]} {
    %c0_i32 = arith.constant 0 : i32
    %0 = arith.cmpi eq, %arg1, %c0_i32 : i32
    %1 = arith.extui %0 : i1 to i32
    %c0_i32_0 = arith.constant 0 : i32
    %2 = arith.cmpi ne, %1, %c0_i32_0 : i32
    scf.if %2 {
      %cst = arith.constant 0.000000e+00 : f32
      %14 = vector.broadcast %cst : f32 to vector<4x256xf32>
      %c0_13 = arith.constant 0 : index
      %c0_14 = arith.constant 0 : index
      %15 = vector.load %arg11[%c0_13, %c0_14] : memref<4x256xf32, #tpu.memory_space<vmem>>, vector<4x256xf32>
      tpu.vector_store %arg11[%c0_13, %c0_14], %14 {strides = array<i32>} : memref<4x256xf32, #tpu.memory_space<vmem>>, vector<4x256xf32>,
      %cst_15 = arith.constant 0xFF800000 : f32
      %16 = vector.broadcast %cst_15 : f32 to vector<4x256xf32>
      %c0_16 = arith.constant 0 : index
      %c0_17 = arith.constant 0 : index
      %17 = vector.load %arg12[%c0_16, %c0_17] : memref<4x256xf32, #tpu.memory_space<vmem>>, vector<4x256xf32>
      tpu.vector_store %arg12[%c0_16, %c0_17], %16 {strides = array<i32>} : memref<4x256xf32, #tpu.memory_space<vmem>>, vector<4x256xf32>,
    } else {
    }
    %c0 = arith.constant 0 : index
    %c0_1 = arith.constant 0 : index
    %c0_2 = arith.constant 0 : index
    %3 = vector.load %arg2[%c0, %c0_1, %c0_2] : memref<1x4x256xf32, #tpu.memory_space<vmem>>, vector<1x4x256xf32>
    %4 = vector.shape_cast %3 : vector<1x4x256xf32> to vector<4x256xf32>
    %c0_3 = arith.constant 0 : index
    %c0_4 = arith.constant 0 : index
    %5 = vector.load %arg11[%c0_3, %c0_4] : memref<4x256xf32, #tpu.memory_space<vmem>>, vector<4x256xf32>
    %6 = arith.addf %5, %4 : vector<4x256xf32>
    %c0_5 = arith.constant 0 : index
    %c0_6 = arith.constant 0 : index
    %7 = vector.load %arg11[%c0_5, %c0_6] : memref<4x256xf32, #tpu.memory_space<vmem>>, vector<4x256xf32>
    tpu.vector_store %arg11[%c0_5, %c0_6], %6 {strides = array<i32>} : memref<4x256xf32, #tpu.memory_space<vmem>>, vector<4x256xf32>,
    %c0_7 = arith.constant 0 : index
    %c0_8 = arith.constant 0 : index
    %8 = vector.load %arg12[%c0_7, %c0_8] : memref<4x256xf32, #tpu.memory_space<vmem>>, vector<4x256xf32>
    %9 = arith.maximumf %8, %4 : vector<4x256xf32>
    %c0_9 = arith.constant 0 : index
    %c0_10 = arith.constant 0 : index
    %10 = vector.load %arg12[%c0_9, %c0_10] : memref<4x256xf32, #tpu.memory_space<vmem>>, vector<4x256xf32>
    tpu.vector_store %arg12[%c0_9, %c0_10], %9 {strides = array<i32>} : memref<4x256xf32, #tpu.memory_space<vmem>>, vector<4x256xf32>,
    %c0_i32_11 = arith.constant 0 : i32
    %11 = arith.cmpi eq, %arg1, %c0_i32_11 : i32
    %12 = arith.extui %11 : i1 to i32
    %c0_i32_12 = arith.constant 0 : i32
    %13 = arith.cmpi ne, %12, %c0_i32_12 : i32
    scf.if %13 {
      %c0_13 = arith.constant 0 : index
      %c0_14 = arith.constant 0 : index
      %14 = vector.load %arg11[%c0_13, %c0_14] : memref<4x256xf32, #tpu.memory_space<vmem>>, vector<4x256xf32>
      %cst = arith.constant dense<0.000000e+00> : vector<4xf32>
      %15 = vector.multi_reduction <add>, %14, %cst [1] : vector<4x256xf32> to vector<4xf32>
      %16 = vector.shape_cast %15 : vector<4xf32> to vector<4x1xf32>
      %cst_15 = arith.constant 3.906250e-03 : f32
      %17 = vector.broadcast %cst_15 : f32 to vector<4x1xf32>
      %18 = arith.mulf %16, %17 : vector<4x1xf32>
      %c0_16 = arith.constant 0 : index
      %c0_17 = arith.constant 0 : index
      %19 = vector.load %arg12[%c0_16, %c0_17] : memref<4x256xf32, #tpu.memory_space<vmem>>, vector<4x256xf32>
      %cst_18 = arith.constant dense<0xFF800000> : vector<4xf32>
      %20 = vector.multi_reduction <maximumf>, %19, %cst_18 [1] : vector<4x256xf32> to vector<4xf32>
      %21 = vector.shape_cast %20 : vector<4xf32> to vector<4x1xf32>
      %c0_19 = arith.constant 0 : index
      %c0_20 = arith.constant 0 : index
      %c0_21 = arith.constant 0 : index
      %22 = vector.load %arg3[%c0_19, %c0_20, %c0_21] : memref<1x64x1xf32, #tpu.memory_space<vmem>>, vector<1x64x1xf32>
      %23 = vector.shape_cast %22 : vector<1x64x1xf32> to vector<64x1xf32>
      %c0_22 = arith.constant 0 : index
      %c0_23 = arith.constant 0 : index
      %24 = vector.load %arg4[%c0_22, %c0_23] : memref<4x16xf32, #tpu.memory_space<vmem>>, vector<4x16xf32>
      %c0_24 = arith.constant 0 : index
      %c0_25 = arith.constant 0 : index
      %25 = vector.load %arg5[%c0_24, %c0_25] : memref<4x16xf32, #tpu.memory_space<vmem>>, vector<4x16xf32>
      %c0_26 = arith.constant 0 : index
      %c0_27 = arith.constant 0 : index
      %26 = vector.load %arg6[%c0_26, %c0_27] : memref<64x16xf32, #tpu.memory_space<vmem>>, vector<64x16xf32>
      %27 = vector.broadcast %18 : vector<4x1xf32> to vector<4x16xf32>
      %28 = arith.mulf %27, %24 : vector<4x16xf32>
      %cst_28 = arith.constant dense<0.000000e+00> : vector<16xf32>
      %29 = vector.multi_reduction <add>, %28, %cst_28 [0] : vector<4x16xf32> to vector<16xf32>
      %30 = vector.shape_cast %29 : vector<16xf32> to vector<1x16xf32>
      %31 = vector.broadcast %21 : vector<4x1xf32> to vector<4x16xf32>
      %32 = arith.mulf %31, %25 : vector<4x16xf32>
      %cst_29 = arith.constant dense<0.000000e+00> : vector<16xf32>
      %33 = vector.multi_reduction <add>, %32, %cst_29 [0] : vector<4x16xf32> to vector<16xf32>
      %34 = vector.shape_cast %33 : vector<16xf32> to vector<1x16xf32>
      %35 = arith.addf %30, %34 : vector<1x16xf32>
      %36 = vector.broadcast %23 : vector<64x1xf32> to vector<64x16xf32>
      %37 = arith.mulf %36, %26 : vector<64x16xf32>
      %cst_30 = arith.constant dense<0.000000e+00> : vector<16xf32>
      %38 = vector.multi_reduction <add>, %37, %cst_30 [0] : vector<64x16xf32> to vector<16xf32>
      %39 = vector.shape_cast %38 : vector<16xf32> to vector<1x16xf32>
      %40 = arith.addf %35, %39 : vector<1x16xf32>
      %c0_31 = arith.constant 0 : index
      %c0_32 = arith.constant 0 : index
      %41 = vector.load %arg7[%c0_31, %c0_32] : memref<1x16xf32, #tpu.memory_space<vmem>>, vector<1x16xf32>
      %42 = arith.addf %40, %41 : vector<1x16xf32>
      %cst_33 = arith.constant 0.000000e+00 : f32
      %43 = vector.broadcast %cst_33 : f32 to vector<1x16xf32>
      %44 = arith.maximumf %42, %43 : vector<1x16xf32>
      %45 = vector.shape_cast %44 : vector<1x16xf32> to vector<16x1xf32>
      %c0_34 = arith.constant 0 : index
      %c0_35 = arith.constant 0 : index
      %46 = vector.load %arg8[%c0_34, %c0_35] : memref<16x8xf32, #tpu.memory_space<vmem>>, vector<16x8xf32>
      %47 = vector.broadcast %45 : vector<16x1xf32> to vector<16x8xf32>
      %48 = arith.mulf %47, %46 : vector<16x8xf32>
      %cst_36 = arith.constant dense<0.000000e+00> : vector<8xf32>
      %49 = vector.multi_reduction <add>, %48, %cst_36 [0] : vector<16x8xf32> to vector<8xf32>
      %50 = vector.shape_cast %49 : vector<8xf32> to vector<1x8xf32>
      %c0_37 = arith.constant 0 : index
      %c0_38 = arith.constant 0 : index
      %51 = vector.load %arg9[%c0_37, %c0_38] : memref<1x8xf32, #tpu.memory_space<vmem>>, vector<1x8xf32>
      %52 = arith.addf %50, %51 : vector<1x8xf32>
      %c0_39 = arith.constant 0 : index
      %c0_40 = arith.constant 0 : index
      %c0_41 = arith.constant 0 : index
      %53 = vector.load %arg10[%c0_39, %c0_40, %c0_41] : memref<1x1x8xf32, #tpu.memory_space<vmem>>, vector<1x1x8xf32>
      %54 = vector.shape_cast %53 : vector<1x1x8xf32> to vector<1x8xf32>
      %55 = vector.shape_cast %52 : vector<1x8xf32> to vector<1x1x8xf32>
      tpu.vector_store %arg10[%c0_39, %c0_40, %c0_41], %55 {strides = array<i32>} : memref<1x1x8xf32, #tpu.memory_space<vmem>>, vector<1x1x8xf32>,
    } else {
    }
    return
  }
  func.func @transform_0(%arg0: i32, %arg1: i32) -> (i32, i32, i32) {
    %c0_i32 = arith.constant 0 : i32
    %c0_i32_0 = arith.constant 0 : i32
    return %arg0, %c0_i32, %arg1 : i32, i32, i32
  }
  func.func @transform_1(%arg0: i32, %arg1: i32) -> (i32, i32, i32) {
    %c0_i32 = arith.constant 0 : i32
    %c0_i32_0 = arith.constant 0 : i32
    %c0_i32_1 = arith.constant 0 : i32
    return %arg0, %c0_i32, %c0_i32_0 : i32, i32, i32
  }
  func.func @transform_2(%arg0: i32, %arg1: i32) -> (i32, i32) {
    %c0_i32 = arith.constant 0 : i32
    %c0_i32_0 = arith.constant 0 : i32
    %c0_i32_1 = arith.constant 0 : i32
    return %c0_i32, %c0_i32_0 : i32, i32
  }
  func.func @transform_3(%arg0: i32, %arg1: i32) -> (i32, i32) {
    %c0_i32 = arith.constant 0 : i32
    %c0_i32_0 = arith.constant 0 : i32
    %c0_i32_1 = arith.constant 0 : i32
    return %c0_i32, %c0_i32_0 : i32, i32
  }
  func.func @transform_4(%arg0: i32, %arg1: i32) -> (i32, i32) {
    %c0_i32 = arith.constant 0 : i32
    %c0_i32_0 = arith.constant 0 : i32
    %c0_i32_1 = arith.constant 0 : i32
    return %c0_i32, %c0_i32_0 : i32, i32
  }
  func.func @transform_5(%arg0: i32, %arg1: i32) -> (i32, i32) {
    %c0_i32 = arith.constant 0 : i32
    %c0_i32_0 = arith.constant 0 : i32
    %c0_i32_1 = arith.constant 0 : i32
    return %c0_i32, %c0_i32_0 : i32, i32
  }
  func.func @transform_6(%arg0: i32, %arg1: i32) -> (i32, i32) {
    %c0_i32 = arith.constant 0 : i32
    %c0_i32_0 = arith.constant 0 : i32
    %c0_i32_1 = arith.constant 0 : i32
    return %c0_i32, %c0_i32_0 : i32, i32
  }
  func.func @transform_7(%arg0: i32, %arg1: i32) -> (i32, i32) {
    %c0_i32 = arith.constant 0 : i32
    %c0_i32_0 = arith.constant 0 : i32
    %c0_i32_1 = arith.constant 0 : i32
    return %c0_i32, %c0_i32_0 : i32, i32
  }
  func.func @transform_8(%arg0: i32, %arg1: i32) -> (i32, i32, i32) {
    %c0_i32 = arith.constant 0 : i32
    %c0_i32_0 = arith.constant 0 : i32
    %c0_i32_1 = arith.constant 0 : i32
    return %arg0, %c0_i32, %c0_i32_0 : i32, i32, i32
  }
}

</mosaic_0001>

<bundles_post_ra>
// kernel: tpu_custom_call.1
= control target key start
LH: loop header
LB: loop body
LE: loop exit
PB: predicated region body
PF: predicated region fallthrough
CT: control target
= control target key end

     0   :  { %13 = vsyncpa [#allocation5], 0  ;;  %s970_s0 = inlined_call_operand.vmem [shape: f32[2,4,256], index: 0, kind: input, shape index: {}]   ;;  %s971_s1 = inlined_call_operand.vmem [shape: f32[2,64,1], index: 1, kind: input, shape index: {}]   ;;  %s972_s2 = inlined_call_operand.vmem [shape: f32[4,16], index: 2, kind: input, shape index: {}]   ;;  %s973_s3 = inlined_call_operand.vmem [shape: f32[4,16], index: 3, kind: input, shape index: {}]   ;;  %s974_s4 = inlined_call_operand.vmem [shape: f32[64,16], index: 4, kind: input, shape index: {}]   ;;  %s975_s5 = inlined_call_operand.vmem [shape: f32[1,16], index: 5, kind: input, shape index: {}]   ;;  %s976_s6 = inlined_call_operand.vmem [shape: f32[16,8], index: 6, kind: input, shape index: {}]   ;;  %s977_s7 = inlined_call_operand.vmem [shape: f32[1,8], index: 7, kind: input, shape index: {}]   ;;  %s978_s8 = inlined_call_operand.hbm [shape: f32[2,1,8], index: 8, kind: output, shape index: {}]  }
   0x1   :  { %15 = vsyncpa [#allocation5 + $0x1], 0  ;;  %s818_s27 = smov 0   ;;  %s820_s28 = smov 0  }
   0x2   :  { %s822_s29 = smov 0   ;;  %s824_s30 = smov 0  }
   0x3   :  { %s826_s9 = smov 0   ;;  %s828_s10 = smov 0  }
   0x4 LB: > { %s620_s11 = sadd.s32 4294967295, %s769_s10   ;;  %s621_s12 = sadd.s32 4294967294, %s769_s10   ;;  %s769_s10 = sphi %s828_s10, %s21_s10   ;;  %s765_s9 = sphi %s826_s9, %s985_s9   ;;  %s761_s30 = sphi %s824_s30, %s984_s30   ;;  %s757_s29 = sphi %s822_s29, %s983_s29   ;;  %s753_s28 = sphi %s820_s28, %s982_s28   ;;  %s749_s27 = sphi %s818_s27, %s981_s27  }
   0x5   : > { %s33_s13 = sadd.s32 1, %s765_s9  ;;  %s220_s14 = sadd.s32 1, %s757_s29 }
   0x6   : > { %p35_p0 = scmp.ge.s32.totalorder %s33_s13, 2  ;;  %p230_p1 = scmp.ne.s32.totalorder %s757_s29, %s753_s28 }
   0x7   : > { %p231_p2 = scmp.eq.s32.totalorder %s620_s11, 1  ;;  %p236_p3 = scmp.ne.s32.totalorder %s753_s28, %s749_s27 }
   0x8   : > { %s987_s13 = smov (%p35_p0, %s33_s13), 0  ;;  %p237_p5 = scmp.eq.s32.totalorder %s621_s12, 1 }
   0x9   : > { %p858_p4 = por %p231_p2, %p230_p1  ;;  %s217_s16 = ssub.s32 %s765_s9, %s987_s13 }
   0xa   : > { %p624_p6 = scmp.ge.s32.totalorder %s769_s10, 1  ;;  %p218_p7 = scmp.eq.s32.totalorder %s217_s16, 0 }
   0xb   : > { %p865_p8 = por %p237_p5, %p236_p3  ;;  %p294_p9 = scmp.lt.s32.totalorder %s769_s10, 3 }
   0xc   : > { %s871_s18 = scalar_select %p218_p7, %s757_s29, %s220_s14  }
   0xd   : > { %p295_p10 = pnand %p624_p6, %p294_p9 }
   0xe   : > { %p337_p11 = scmp.lt.s32.totalorder (!%p295_p10), %s761_s30, 1  ;;  %s334_s16 = sand.u32 (!%p295_p10), 1, %s753_s28  }
   0xf   : > { %298 = sbr.rel (%p295_p10) target bundleno = 364 (0x16c), region = 52  ;;  %s629_s21 = sshll.u32 (!%p295_p10), %s761_s30, 4 }
  0x10   : > { %s335_s22 = scalar_lea.vmem (!%p295_p10), [#allocation4], %s334_s16  ;;  %s537_s26 = scalar_lea.hbm (!%p295_p10), %s978_s8, %s629_s21 }
  0x11   : > { %s772_s14 = smov (!%p295_p10), [#allocation4]  }
  0x14   : > { %v771_v0 = vmov 0   ;;  %s338_s19 = scalar_select %p337_p11, %s761_s30, 1  ;;  %vm371_vm0 = vcmask 1043456   ;;  %v395_v21 = vld [vmem:[%s972_s2] sm:$0xf]  ;;  %v399_v27 = vld [vmem:[%s974_s4 + $0x10] sm:$0xff] }
  0x15   : > { %690 = vset.pattern.permute.xlu1 %v771_v0  ;;  %691 = vset.pattern.permute.xlu0 %v771_v0  ;;  %v396_v22 = vld [vmem:[%s973_s3] sm:$0xf]  ;;  %v398_v28 = vld [vmem:[%s974_s4 + $0x8] sm:$0xff]  ;;  %vm406_vm1 = vcmask 125952   ;;  %vm471_vm2 = vcmask 130048   ;;  %v400_v37 = vld [vmem:[%s974_s4 + $0x18] sm:$0xff] }
  0x16   : > { %s632_s20 = sshll.u32 %s338_s19, 3  ;;  %s633_s24 = sshll.u32 %s338_s19, 6  ;;  %v397_v23 = vld [vmem:[%s974_s4] sm:$0xff]  ;;  %v403_v48 = vld [vmem:[%s974_s4 + $0x30] sm:$0xff]  ;;  %v402_v50 = vld [vmem:[%s974_s4 + $0x28] sm:$0xff]  ;;  %vm512_vm3 = vcmask 64512  }
  0x17   : > { %s344_s23 = scalar_lea.vmem %s970_s0, %s632_s20  ;;  %s350_s11 = scalar_lea.vmem %s971_s1, %s633_s24  ;;  %v401_v35 = vld [vmem:[%s974_s4 + $0x20] sm:$0xff]  ;;  %v404_v54 = vld [vmem:[%s974_s4 + $0x38] sm:$0xff]  ;;  %vm524_vm4 = vcmask 57344  }
  0x18   : > { %v357_v1 = vld [vmem:[%s344_s23] sm:$0xff]  ;;  %v389_v9 = vld [vmem:[%s350_s11 + $0x10] sm:$0xff]  ;;  %v388_v13 = vld [vmem:[%s350_s11 + $0x8] sm:$0xff]  ;;  %s539_s23 = sshll.u32 %s335_s22, 4  ;;  %s697_s19 = sshll.u32 %s772_s14, 4  ;;  %s540_s23 = int_to_ptr.vmem [resolvable:$true] %s539_s23  ;;  %s698_s19 = int_to_ptr.vmem [resolvable:$false] %s697_s19 }
  0x19   : > { %v369_v2 = vcombine.high %v357_v1, %v357_v1  ;;  %v382_v3 = vsel %vm371_vm0, %v357_v1, -inf  ;;  %v372_v4 = vsel %vm371_vm0, %v357_v1, 0.0  ;;  %v391_v10 = vld [vmem:[%s350_s11 + $0x20] sm:$0xff]  ;;  %v393_v12 = vld [vmem:[%s350_s11 + $0x30] sm:$0xff]  ;;  %v394_v14 = vld [vmem:[%s350_s11 + $0x38] sm:$0xff]  ;;  %s693_s12 = scalar_lea.vmem %s540_s23, 16  ;;  %p700_p1 = scmp.lt.s32.totalorder %s540_s23, %s698_s19 }
  0x1a   : > { %v387_v11 = vld [vmem:[%s350_s11] sm:$0xff]  ;;  %v390_v15 = vld [vmem:[%s350_s11 + $0x18] sm:$0xff]  ;;  %v392_v16 = vld [vmem:[%s350_s11 + $0x28] sm:$0xff]  ;;  %s527_s11 = scalar_lea.sflag [#allocation5], %s334_s16  ;;  %p694_p12 = scmp.ne.s32.totalorder %s540_s23, %s693_s12 }
  0x1b   : > { %v383_v5 = vsel %vm371_vm0, %v369_v2, -inf  ;;  %v373_v6 = vsel %vm371_vm0, %v369_v2, 0.0  ;;  %s699_s30 = scalar_lea.vmem %s698_s19, 32 }
  0x1c   : > { %v384_v7 = vmax.f32 %v382_v3, %v383_v5  ;;  %v374_v8 = vadd.f32 %v373_v6, %v372_v4  ;;  %p695_p13 = pnand %p694_p12, %p858_p4  ;;  %p701_p2 = scmp.lt.s32.totalorder %s699_s30, %s693_s12 }
  0x1e   : > { %385 = vmax.xlane.f32.xlu0 %v384_v7  ;;  %375 = vadd.xlane.f32.xlu1 %v374_v8  ;;  %p696_p0 = pneg %p695_p13  ;;  %p702_p3 = por %p701_p2, %p700_p1 }
  0x20   : > { %p703_p5 = pnand %p702_p3, %p696_p0 }
  0x2f   : > { %435 = vperm.xlu1 %690, %v389_v9  }
  0x33   : > { %445 = vperm.xlu1 %690, %v391_v10  }
  0x34   : > { %425 = vperm.xlu0 %691, %v387_v11  }
  0x37   : > { %455 = vperm.xlu1 %690, %v393_v12  }
  0x38   : > { %430 = vperm.xlu0 %691, %v388_v13  }
  0x3b   : > { %460 = vperm.xlu1 %690, %v394_v14  }
  0x3c   : > { %440 = vperm.xlu0 %691, %v390_v15  }
  0x40   : > { %450 = vperm.xlu0 %691, %v392_v16   ;;  %v497_v16 = vlaneseq }
  0xa7   : > { %v376_v17 = vpop.xlane.xlu1 %375  ;;  %v386_v18 = vpop.xlane.xlu0 %385 }
  0xa8   : > { %v377_v20 = vmul.f32 0.00390625, %v376_v17  ;;  %v414_v29 = vmul.f32 %v396_v22, %v386_v18  ;;  %v494_v22 = vld [vmem:[%s975_s5] sm:$0x1] }
  0xaa   : > { %v405_v26 = vmul.f32 %v395_v21, %v377_v20  ;;  %v415_v38 = vsel %vm406_vm1, %v414_v29, 0.0  ;;  %v498_v21 = vshrl.u32 %v497_v16, 7  ;;  %v508_v29 = vld [vmem:[%s976_s6] sm:$0xff] }
  0xab   : > { %v436_v19 = vpop.permute.xlu1 %435  ;;  %v416_v47 = vrot.slane %v415_v38, 4 }
  0xac   : > { %v407_v32 = vsel %vm406_vm1, %v405_v26, 0.0  ;;  %v465_v33 = vmul.f32 %v436_v19, %v399_v27 }
  0xad   : > { %v408_v41 = vrot.slane %v407_v32, 4  ;;  %v417_v60 = vadd.f32 %v416_v47, %v415_v38 }
  0xae   : > { %v475_v44 = vsel %vm471_vm2, %v465_v33, 0.0 }
  0xaf   : > { %v426_v24 = vpop.permute.xlu0 %425  ;;  %v446_v25 = vpop.permute.xlu1 %445  ;;  %v409_v52 = vadd.f32 %v408_v41, %v407_v32  ;;  %v418_v3 = vrot.slane %v417_v60, 2 }
  0xb0   : > { %v463_v30 = vmul.f32 %v426_v24, %v397_v23  ;;  %v467_v45 = vmul.f32 %v446_v25, %v401_v35  ;;  %v499_v25 = vsub.s32 0, %v498_v21 }
  0xb1   : > { %v410_v0 = vrot.slane %v409_v52, 2  ;;  %v419_v8 = vadd.f32 %v418_v3, %v417_v60 }
  0xb2   : > { %v472_v39 = vsel %vm471_vm2, %v463_v30, 0.0  ;;  %v479_v57 = vsel %vm471_vm2, %v467_v45, 0.0 }
  0xb3   : > { %v431_v31 = vpop.permute.xlu0 %430  ;;  %v456_v36 = vpop.permute.xlu1 %455  ;;  %v411_v6 = vadd.f32 %v410_v0, %v409_v52  ;;  %v420_v12 = vrot.slane %v419_v8, 1 }
  0xb4   : > { %v464_v34 = vmul.f32 %v431_v31, %v398_v28  ;;  %v469_v58 = vmul.f32 %v456_v36, %v403_v48  ;;  %v509_v28 = vld [vmem:[%s976_s6 + $0x8] sm:$0xff] }
  0xb5   : > { %v412_v10 = vrot.slane %v411_v6, 1  ;;  %v421_v17 = vadd.f32 %v420_v12, %v419_v8 }
  0xb6   : > { %v473_v40 = vsel %vm471_vm2, %v464_v34, 0.0  ;;  %v483_v2 = vsel %vm471_vm2, %v469_v58, 0.0 }
  0xb7   : > { %v474_v42 = vadd.f32 %v473_v40, %v472_v39  ;;  %v441_v43 = vpop.permute.xlu0 %440  ;;  %v461_v55 = vpop.permute.xlu1 %460  ;;  %v413_v14 = vadd.f32 %v412_v10, %v411_v6 }
  0xb8   : > { %v466_v46 = vmul.f32 %v441_v43, %v400_v37  ;;  %v470_v62 = vmul.f32 %v461_v55, %v404_v54 }
  0xb9   : > { %v476_v49 = vadd.f32 %v475_v44, %v474_v42  ;;  %v422_v19 = vadd.f32 %v421_v17, %v413_v14  ;;  %v522_v42 = vld [vmem:[%s977_s7] sm:$0x1] }
  0xba   : > { %v477_v51 = vsel %vm471_vm2, %v466_v46, 0.0  ;;  %v485_v5 = vsel %vm471_vm2, %v470_v62, 0.0 }
  0xbb   : > { %v478_v53 = vadd.f32 %v477_v51, %v476_v49  ;;  %v451_v56 = vpop.permute.xlu0 %450 }
  0xbc   : > { %v468_v59 = vmul.f32 %v451_v56, %v402_v50 }
  0xbd   : > { %v480_v61 = vadd.f32 %v479_v57, %v478_v53 }
  0xbe   : > { %v481_v63 = vsel %vm471_vm2, %v468_v59, 0.0 }
  0xbf   : > { %v482_v1 = vadd.f32 %v481_v63, %v480_v61 }
  0xc1   : > { %v484_v4 = vadd.f32 %v483_v2, %v482_v1 }
  0xc3   : > { %v486_v7 = vadd.f32 %v485_v5, %v484_v4 }
  0xc5   : > { %v487_v9 = vrot.slane %v486_v7, 4 }
  0xc7   : > { %v488_v11 = vadd.f32 %v487_v9, %v486_v7 }
  0xc9   : > { %v489_v13 = vrot.slane %v488_v11, 2 }
  0xcb   : > { %v490_v15 = vadd.f32 %v489_v13, %v488_v11 }
  0xcd   : > { %v491_v18 = vrot.slane %v490_v15, 1 }
  0xcf   : > { %v492_v20 = vadd.f32 %v491_v18, %v490_v15 }
  0xd1   : > { %v493_v23 = vadd.f32 %v492_v20, %v422_v19 }
  0xd3   : > { %v495_v24 = vadd.f32 %v494_v22, %v493_v23 }
  0xd5   : > { %v496_v26 = vmax.f32 %v495_v24, 0.0 }
  0xd7   : > { %v500_v27 = vrot.slane %v496_v26, %v499_v25 }
  0xd9   : > { %506 = vbcast.lane.b32.xlu1 %v500_v27, 264  ;;  %502 = vbcast.lane.b32.xlu0 %v500_v27, 256 }
 0x14b   : > { %v507_v30 = vpop.permute.xlu1 %506  ;;  %v503_v31 = vpop.permute.xlu0 %502 }
 0x14c   : > { %v511_v32 = vmul.f32 %v509_v28, %v507_v30  ;;  %v510_v33 = vmul.f32 %v508_v29, %v503_v31 }
 0x14e   : > { %v514_v34 = vsel %vm512_vm3, %v511_v32, 0.0  ;;  %v513_v35 = vsel %vm512_vm3, %v510_v33, 0.0 }
 0x14f   : > { %v515_v36 = vadd.f32 %v514_v34, %v513_v35 }
 0x151   : > { %v516_v37 = vrot.slane %v515_v36, 4 }
 0x153   : > { %v517_v38 = vadd.f32 %v516_v37, %v515_v36 }
 0x155   : > { %v518_v39 = vrot.slane %v517_v38, 2 }
 0x157   : > { %v519_v40 = vadd.f32 %v518_v39, %v517_v38 }
 0x159   : > { %v520_v41 = vrot.slane %v519_v40, 1 }
 0x15b   : > { %v521_v43 = vadd.f32 %v520_v41, %v519_v40 }
 0x15d   : > { %v523_v44 = vadd.f32 %v522_v42, %v521_v43 }
 0x15f   : > { %525 = vst.msk [vmem:[%s335_s22] sm:$0x1] %vm524_vm4, %v523_v44 }
 0x160   : > { %706 = shalt.err (!%p703_p5)
}
 0x161   : > { %s707_s20 = scalar_lea.hbm %s537_s26, 16  ;;  %s711_s22 = scalar_lea.hbm %s978_s8, 32 }
 0x162   : > { %p708_p6 = scmp.ne.s32.totalorder %s537_s26, %s707_s20  ;;  %p712_p10 = scmp.lt.s32.totalorder %s537_s26, %s978_s8 }
 0x163   : > { %p713_p11 = scmp.lt.s32.totalorder %s711_s22, %s707_s20 }
 0x164   : > { %p709_p7 = pnand %p708_p6, %p858_p4 }
 0x165   : > { %p714_p12 = por %p713_p11, %p712_p10 }
 0x166   : > { %p710_p9 = pneg %p709_p7 }
 0x168   : > { %p715_p13 = pnand %p714_p12, %p710_p9 }
 0x16a   : > { %718 = shalt.err (!%p715_p13)
}
 0x16b   : > { %634 = dma.vmem_to_hbm [thread:$0]  (%p858_p4), %s540_s23, 16, %s537_s26, %s527_s11  }
 0x16c PF: > { %p640_p0 = scmp.ge.s32.totalorder %s769_s10, 2  ;;  %s551_s12 = sand.u32 1, %s749_s27  }
 0x16d   : > { %s552_s14 = scalar_lea.sflag [#allocation5], %s551_s12 }
 0x16e   : > { %p637_p1 = pnand %p640_p0, %p865_p8 }
 0x170   : > { %p638_p2 = pneg %p637_p1 }
 0x172   : > { %744 = dma.done.wait (%p638_p2), %s552_s14, 16  }
 0x173   : > { %746 = vsyncadd (%p638_p2), %s552_s14, 4294967280  ;;  %s21_s10 = sadd.s32 1, %s769_s10   ;;  %s981_s27 = smov %s753_s28 }
 0x174   : > { %p18_p3 = scmp.ge.s32.totalorder %s21_s10, 4   ;;  %s982_s28 = smov %s757_s29 }
 0x175   : > { %s983_s29 = smov %s871_s18  ;;  %s984_s30 = smov %s765_s9 }
 0x176   : > { %s985_s9 = smov %s987_s13  ;;  %20 = sbr.rel (!%p18_p3) target bundleno = 4 (0x4), region = 98 }
 0x17b   :  { %556 = vsyncpa [#allocation5], 1 }
 0x17c   :  { %558 = vsyncpa [#allocation5 + $0x1], 1 }

</bundles_post_ra>
